<compile_context>
chip_gen: v7x
topology: tpu7x:2x2x1
jax: 0.10.0
libtpu: 0.0.40
codegen_flags: <defaults>
</compile_context>

<pallas_src>
import functools

import jax
import jax.numpy as jnp
from jax.experimental import pallas as pl
from jax.experimental.pallas import tpu as pltpu


# ------------------------------- kernel --------------------------------------
def _trilinear_kernel(x_ref, lut_ref, o_ref, *, dim, binsize):
    # x_ref:   (1, 3, P)         pixel tile, rows = (r, g, b)
    # lut_ref: (1, 3*D, D*D)     rows = c*D + r (r = fastest LUT axis),
    #                            cols = b*D + g
    # o_ref:   (1, 1, 3, P)      output tile
    d = dim
    x = x_ref[0]                                      # (3, P) f32
    p = x.shape[-1]

    def coords(v):                                    # v: (1, P) in [0, 1]
        s = v / binsize                               # match reference (no inv mul)
        f = jnp.floor(s)
        frac = s - f
        idx = jnp.clip(f, 0.0, float(d - 2)).astype(jnp.int32)
        return idx, frac

    r_idx, r_frac = coords(x[0:1, :])
    g_idx, g_frac = coords(x[1:2, :])
    b_idx, b_frac = coords(x[2:3, :])

    # ---- combined (b, g) corner weights on flattened rows b*D + g ----------
    rows_bg = jax.lax.broadcasted_iota(jnp.int32, (d * d, p), 0)
    base = b_idx * d + g_idx                          # (1, P) int32
    w00 = (1.0 - b_frac) * (1.0 - g_frac)
    w01 = (1.0 - b_frac) * g_frac
    w10 = b_frac * (1.0 - g_frac)
    w11 = b_frac * g_frac
    w_bg = (jnp.where(rows_bg == base, w00, 0.0)
            + jnp.where(rows_bg == base + 1, w01, 0.0)
            + jnp.where(rows_bg == base + d, w10, 0.0)
            + jnp.where(rows_bg == base + d + 1, w11, 0.0))        # (D*D, P)

    # ---- MXU: contract the (b, g) axis for all 3 channels at once ----------
    lut_mat = lut_ref[0]                              # (3*D, D*D)
    t_all = jnp.dot(lut_mat, w_bg,
                    preferred_element_type=jnp.float32)            # (3*D, P)

    # ---- r-axis linear interpolation weights, replicated over channels -----
    rows_3d = jax.lax.broadcasted_iota(jnp.int32, (3 * d, p), 0)
    a_full = jnp.zeros((3 * d, p), jnp.float32)
    for c in range(3):                                # unrolled, 6 cheap wheres
        a_full = (a_full
                  + jnp.where(rows_3d == c * d + r_idx, 1.0 - r_frac, 0.0)
                  + jnp.where(rows_3d == c * d + r_idx + 1, r_frac, 0.0))
    prod = a_full * t_all                             # (3*D, P)

    # ---- per-channel segment sum over the D r-rows, done on the MXU --------
    seg_r = jax.lax.broadcasted_iota(jnp.int32, (3, 3 * d), 0)
    seg_c = jax.lax.broadcasted_iota(jnp.int32, (3, 3 * d), 1)
    seg = jnp.where((seg_c >= seg_r * d) & (seg_c < (seg_r + 1) * d),
                    1.0, 0.0)                         # (3, 3*D) 0/1 constant
    out = jnp.dot(seg, prod, preferred_element_type=jnp.float32)   # (3, P)
    o_ref[0, 0] = out.astype(o_ref.dtype)


# ------------------------------- wrapper --------------------------------------
def _pick_tile(d, hw):
    """Pixel-tile size: large enough to amortize per-step overhead, small
    enough that the (D^2, P) weight buffer fits comfortably in VMEM on
    v5e (16 MiB scoped) / v7x (64 MiB physical)."""
    if d <= 17:
        tile = 2048
    elif d <= 33:
        tile = 1024
    else:
        tile = 512
    hw_round = ((hw + 255) // 256) * 256              # don't tile past the image
    return min(tile, max(256, hw_round))


@functools.partial(jax.jit, static_argnames=("mode",))
def _apply_lut(lut, x, mode):
    """lut: (L, 3, D, D, D); x: (N, 3, H, W).

    mode: "shared" (L == 1), "per_sample" (L == N), "broadcast" (L > 1, L != N).
    Returns (N, 3, H, W) for shared/per_sample, (N, L, 3, H, W) for broadcast.
    """
    orig_dtype = x.dtype
    lut = lut.astype(jnp.float32)
    x = x.astype(jnp.float32)
    l, _, d, _, _ = lut.shape
    n, c, h, w = x.shape
    assert c == 3, "input must be RGB (3 channels)"
    binsize = 1.000001 / (d - 1)                      # matches the reference op

    hw = h * w
    tile = _pick_tile(d, hw)
    hw_pad = ((hw + tile - 1) // tile) * tile
    x_flat = x.reshape(n, 3, hw)
    if hw_pad != hw:
        x_flat = jnp.pad(x_flat, ((0, 0), (0, 0), (0, hw_pad - hw)))

    # Lane-dense LUT layout: rows = c*D + r, cols = b*D + g.
    lut_mat = lut.transpose(0, 1, 4, 2, 3).reshape(l, 3 * d, d * d)

    if mode == "broadcast":
        l_grid = l
        lut_map = lambda li, ni, t: (li, 0, 0)
    elif mode == "per_sample":
        l_grid = 1
        lut_map = lambda li, ni, t: (ni, 0, 0)
    else:  # shared single LUT
        l_grid = 1
        lut_map = lambda li, ni, t: (0, 0, 0)

    kernel = functools.partial(_trilinear_kernel, dim=d, binsize=float(binsize))
    out = pl.pallas_call(
        kernel,
        out_shape=jax.ShapeDtypeStruct((n, l_grid, 3, hw_pad), jnp.float32),
        grid_spec=pltpu.PrefetchScalarGridSpec(
            num_scalar_prefetch=0,
            grid=(l_grid, n, hw_pad // tile),
            in_specs=[
                pl.BlockSpec((1, 3, tile), lambda li, ni, t: (ni, 0, t)),
                pl.BlockSpec((1, 3 * d, d * d), lut_map),
            ],
            out_specs=pl.BlockSpec((1, 1, 3, tile),
                                   lambda li, ni, t: (ni, li, 0, t)),
        ),
        compiler_params=pltpu.CompilerParams(
            dimension_semantics=("parallel", "parallel", "parallel"),
            vmem_limit_bytes=32 * 1024 * 1024),
    )(x_flat, lut_mat)

    out = out[:, :, :, :hw]
    if mode == "broadcast":
        return out.reshape(n, l_grid, 3, h, w).astype(orig_dtype)
    return out[:, 0].reshape(n, 3, h, w).astype(orig_dtype)


def trilinear_interpolation(lut, x):
    """Forward of the PyTorch TrilinearInterpolation module.

    lut: (L, 3, D, D, D); x: (N, 3, H, W).
    Returns (N, 3, H, W) if L == 1 or L == N, else (N, L, 3, H, W).
    """
    l = lut.shape[0]
    n = x.shape[0]
    if l > 1 and l != n:                              # multi-LUT broadcast
        return _apply_lut(lut, x, mode="broadcast")
    if l > 1:                                         # per-sample LUTs (L == N)
        return _apply_lut(lut, x, mode="per_sample")
    return _apply_lut(lut, x, mode="shared")


# ------------------------------ pure-JAX reference ----------------------------
def _reference(lut, x):
    lut = jnp.asarray(lut, jnp.float32)
    x = jnp.asarray(x, jnp.float32)
    d = lut.shape[-1]
    binsize = 1.000001 / (d - 1)
    s = x / binsize
    f = jnp.floor(s)
    idx = jnp.clip(f, 0, d - 2).astype(jnp.int32)
    frac = s - f
    r_id, g_id, b_id = idx[:, 0], idx[:, 1], idx[:, 2]
    r_d, g_d, b_d = frac[:, 0], frac[:, 1], frac[:, 2]
    lut_b = jnp.broadcast_to(lut, (x.shape[0],) + lut.shape[1:]) \
        if lut.shape[0] == 1 else lut
    out = jnp.zeros_like(x)
    for db in (0, 1):
        for dg in (0, 1):
            for dr in (0, 1):
                wgt = ((r_d if dr else 1.0 - r_d)
                       * (g_d if dg else 1.0 - g_d)
                       * (b_d if db else 1.0 - b_d))            # (N, H, W)
                vals = jax.vmap(lambda t, bi, gi, ri: t[:, bi, gi, ri])(
                    lut_b, b_id + db, g_id + dg, r_id + dr)     # (N, 3, H, W)
                out = out + wgt[:, None] * vals
    return out


# ---------------------------------- test ---------------------------------------
if __name__ == "__main__":
    key = jax.random.PRNGKey(0)
    k_lut, k_lut2, k_x = jax.random.split(key, 3)

    N, C, H, W, D = 2, 3, 16, 16, 9
    x = jax.random.uniform(k_x, (N, C, H, W), jnp.float32)       # values in [0, 1)
    lut = jax.random.uniform(k_lut, (N, C, D, D, D), jnp.float32)

    # 1) Per-sample LUT branch (L == N > 1).
    out = trilinear_interpolation(lut, x)
    jax.block_until_ready(out)
    assert out.shape == (N, C, H, W), out.shape
    assert bool(jnp.all(jnp.isfinite(out)))
    ref = _reference(lut, x)
    assert jnp.allclose(out, ref, atol=1e-4, rtol=1e-4), \
        float(jnp.max(jnp.abs(out - ref)))

    # 2) Shared single-LUT branch (L == 1).
    out1 = trilinear_interpolation(lut[:1], x)
    jax.block_until_ready(out1)
    ref1 = _reference(lut[:1], x)
    assert out1.shape == (N, C, H, W)
    assert jnp.allclose(out1, ref1, atol=1e-4, rtol=1e-4), \
        float(jnp.max(jnp.abs(out1 - ref1)))

    # 3) Multi-LUT broadcast branch (1 < L != N) -> (N, L, 3, H, W).
    L = 3
    lut_m = jax.random.uniform(k_lut2, (L, C, D, D, D), jnp.float32)
    out_m = trilinear_interpolation(lut_m, x)
    jax.block_until_ready(out_m)
    assert out_m.shape == (N, L, C, H, W), out_m.shape
    ref_m = jnp.stack([_reference(lut_m[i:i + 1], x) for i in range(L)], axis=1)
    assert jnp.allclose(out_m, ref_m, atol=1e-4, rtol=1e-4), \
        float(jnp.max(jnp.abs(out_m - ref_m)))

    print("KERNEL_OK")
</pallas_src>

<mosaic_0001>
module attributes {stable_mosaic.version = 11 : i64} {
  func.func @_trilinear_kernel(%arg0: i32, %arg1: i32, %arg2: i32, %arg3: memref<1x3x256xf32, #tpu.memory_space<vmem>>, %arg4: memref<1x27x81xf32, #tpu.memory_space<vmem>>, %arg5: memref<1x1x3x256xf32, #tpu.memory_space<vmem>>) attributes {dimension_semantics = [#tpu.dimension_semantics<parallel>, #tpu.dimension_semantics<parallel>, #tpu.dimension_semantics<parallel>], iteration_bounds = array<i64: 1, 2, 1>, scalar_prefetch = 0 : i64, scratch_operands = 0 : i64, tpu.core_type = #tpu.core_type<tc>, window_params = [{transform_indices = @transform_0, window_bounds = array<i64: 1, 3, 256>}, {transform_indices = @transform_1, window_bounds = array<i64: 1, 27, 81>}, {transform_indices = @transform_2, window_bounds = array<i64: 1, 1, 3, 256>}]} {
    %c0 = arith.constant 0 : index
    %c0_0 = arith.constant 0 : index
    %c0_1 = arith.constant 0 : index
    %0 = vector.load %arg3[%c0, %c0_0, %c0_1] : memref<1x3x256xf32, #tpu.memory_space<vmem>>, vector<1x3x256xf32>
    %1 = vector.shape_cast %0 : vector<1x3x256xf32> to vector<3x256xf32>
    %2 = vector.extract_strided_slice %1 {offsets = [0, 0], sizes = [1, 256], strides = [1, 1]} : vector<3x256xf32> to vector<1x256xf32>
    %cst = arith.constant 0.125000119 : f32
    %3 = vector.broadcast %cst : f32 to vector<1x256xf32>
    %4 = arith.divf %2, %3 : vector<1x256xf32>
    %5 = math.floor %4 : vector<1x256xf32>
    %6 = arith.subf %4, %5 : vector<1x256xf32>
    %cst_2 = arith.constant 0.000000e+00 : f32
    %cst_3 = arith.constant 7.000000e+00 : f32
    %7 = vector.broadcast %cst_2 : f32 to vector<1x256xf32>
    %8 = arith.maximumf %7, %5 : vector<1x256xf32>
    %9 = vector.broadcast %cst_3 : f32 to vector<1x256xf32>
    %10 = arith.minimumf %9, %8 : vector<1x256xf32>
    %11 = arith.fptosi %10 : vector<1x256xf32> to vector<1x256xi32>
    %12 = vector.extract_strided_slice %1 {offsets = [1, 0], sizes = [1, 256], strides = [1, 1]} : vector<3x256xf32> to vector<1x256xf32>
    %cst_4 = arith.constant 0.125000119 : f32
    %13 = vector.broadcast %cst_4 : f32 to vector<1x256xf32>
    %14 = arith.divf %12, %13 : vector<1x256xf32>
    %15 = math.floor %14 : vector<1x256xf32>
    %16 = arith.subf %14, %15 : vector<1x256xf32>
    %cst_5 = arith.constant 0.000000e+00 : f32
    %cst_6 = arith.constant 7.000000e+00 : f32
    %17 = vector.broadcast %cst_5 : f32 to vector<1x256xf32>
    %18 = arith.maximumf %17, %15 : vector<1x256xf32>
    %19 = vector.broadcast %cst_6 : f32 to vector<1x256xf32>
    %20 = arith.minimumf %19, %18 : vector<1x256xf32>
    %21 = arith.fptosi %20 : vector<1x256xf32> to vector<1x256xi32>
    %22 = vector.extract_strided_slice %1 {offsets = [2, 0], sizes = [1, 256], strides = [1, 1]} : vector<3x256xf32> to vector<1x256xf32>
    %cst_7 = arith.constant 0.125000119 : f32
    %23 = vector.broadcast %cst_7 : f32 to vector<1x256xf32>
    %24 = arith.divf %22, %23 : vector<1x256xf32>
    %25 = math.floor %24 : vector<1x256xf32>
    %26 = arith.subf %24, %25 : vector<1x256xf32>
    %cst_8 = arith.constant 0.000000e+00 : f32
    %cst_9 = arith.constant 7.000000e+00 : f32
    %27 = vector.broadcast %cst_8 : f32 to vector<1x256xf32>
    %28 = arith.maximumf %27, %25 : vector<1x256xf32>
    %29 = vector.broadcast %cst_9 : f32 to vector<1x256xf32>
    %30 = arith.minimumf %29, %28 : vector<1x256xf32>
    %31 = arith.fptosi %30 : vector<1x256xf32> to vector<1x256xi32>
    %32 = tpu.iota {dimensions = array<i32: 0>} : vector<81x256xi32>
    %c9_i32 = arith.constant 9 : i32
    %33 = vector.broadcast %c9_i32 : i32 to vector<1x256xi32>
    %34 = arith.muli %31, %33 : vector<1x256xi32>
    %35 = arith.addi %34, %21 : vector<1x256xi32>
    %cst_10 = arith.constant 1.000000e+00 : f32
    %36 = vector.broadcast %cst_10 : f32 to vector<1x256xf32>
    %37 = arith.subf %36, %26 : vector<1x256xf32>
    %cst_11 = arith.constant 1.000000e+00 : f32
    %38 = vector.broadcast %cst_11 : f32 to vector<1x256xf32>
    %39 = arith.subf %38, %16 : vector<1x256xf32>
    %40 = arith.mulf %37, %39 : vector<1x256xf32>
    %cst_12 = arith.constant 1.000000e+00 : f32
    %41 = vector.broadcast %cst_12 : f32 to vector<1x256xf32>
    %42 = arith.subf %41, %26 : vector<1x256xf32>
    %43 = arith.mulf %42, %16 : vector<1x256xf32>
    %cst_13 = arith.constant 1.000000e+00 : f32
    %44 = vector.broadcast %cst_13 : f32 to vector<1x256xf32>
    %45 = arith.subf %44, %16 : vector<1x256xf32>
    %46 = arith.mulf %26, %45 : vector<1x256xf32>
    %47 = arith.mulf %26, %16 : vector<1x256xf32>
    %48 = vector.broadcast %35 : vector<1x256xi32> to vector<81x256xi32>
    %49 = arith.cmpi eq, %32, %48 : vector<81x256xi32>
    %cst_14 = arith.constant 0.000000e+00 : f32
    %50 = vector.shape_cast %40 : vector<1x256xf32> to vector<1x256xf32>
    %51 = vector.broadcast %50 : vector<1x256xf32> to vector<81x256xf32>
    %52 = vector.broadcast %cst_14 : f32 to vector<81x256xf32>
    %53 = arith.select %49, %51, %52 : vector<81x256xi1>, vector<81x256xf32>
    %c1_i32 = arith.constant 1 : i32
    %54 = vector.broadcast %c1_i32 : i32 to vector<1x256xi32>
    %55 = arith.addi %35, %54 : vector<1x256xi32>
    %56 = vector.broadcast %55 : vector<1x256xi32> to vector<81x256xi32>
    %57 = arith.cmpi eq, %32, %56 : vector<81x256xi32>
    %cst_15 = arith.constant 0.000000e+00 : f32
    %58 = vector.shape_cast %43 : vector<1x256xf32> to vector<1x256xf32>
    %59 = vector.broadcast %58 : vector<1x256xf32> to vector<81x256xf32>
    %60 = vector.broadcast %cst_15 : f32 to vector<81x256xf32>
    %61 = arith.select %57, %59, %60 : vector<81x256xi1>, vector<81x256xf32>
    %62 = arith.addf %53, %61 : vector<81x256xf32>
    %c9_i32_16 = arith.constant 9 : i32
    %63 = vector.broadcast %c9_i32_16 : i32 to vector<1x256xi32>
    %64 = arith.addi %35, %63 : vector<1x256xi32>
    %65 = vector.broadcast %64 : vector<1x256xi32> to vector<81x256xi32>
    %66 = arith.cmpi eq, %32, %65 : vector<81x256xi32>
    %cst_17 = arith.constant 0.000000e+00 : f32
    %67 = vector.shape_cast %46 : vector<1x256xf32> to vector<1x256xf32>
    %68 = vector.broadcast %67 : vector<1x256xf32> to vector<81x256xf32>
    %69 = vector.broadcast %cst_17 : f32 to vector<81x256xf32>
    %70 = arith.select %66, %68, %69 : vector<81x256xi1>, vector<81x256xf32>
    %71 = arith.addf %62, %70 : vector<81x256xf32>
    %c9_i32_18 = arith.constant 9 : i32
    %72 = vector.broadcast %c9_i32_18 : i32 to vector<1x256xi32>
    %73 = arith.addi %35, %72 : vector<1x256xi32>
    %c1_i32_19 = arith.constant 1 : i32
    %74 = vector.broadcast %c1_i32_19 : i32 to vector<1x256xi32>
    %75 = arith.addi %73, %74 : vector<1x256xi32>
    %76 = vector.broadcast %75 : vector<1x256xi32> to vector<81x256xi32>
    %77 = arith.cmpi eq, %32, %76 : vector<81x256xi32>
    %cst_20 = arith.constant 0.000000e+00 : f32
    %78 = vector.shape_cast %47 : vector<1x256xf32> to vector<1x256xf32>
    %79 = vector.broadcast %78 : vector<1x256xf32> to vector<81x256xf32>
    %80 = vector.broadcast %cst_20 : f32 to vector<81x256xf32>
    %81 = arith.select %77, %79, %80 : vector<81x256xi1>, vector<81x256xf32>
    %82 = arith.addf %71, %81 : vector<81x256xf32>
    %c0_21 = arith.constant 0 : index
    %c0_22 = arith.constant 0 : index
    %c0_23 = arith.constant 0 : index
    %83 = vector.load %arg4[%c0_21, %c0_22, %c0_23] : memref<1x27x81xf32, #tpu.memory_space<vmem>>, vector<1x27x81xf32>
    %84 = vector.shape_cast %83 : vector<1x27x81xf32> to vector<27x81xf32>
    %cst_24 = arith.constant dense<0.000000e+00> : vector<27x256xf32>
    %85 = tpu.matmul %84, %82, %cst_24 {dimension_numbers = #tpu.dot_dimension_numbers<[1], [0], [0], [1], [0, 0, 1, 1], [], []>} : vector<27x81xf32>, vector<81x256xf32>, vector<27x256xf32> -> vector<27x256xf32>
    %86 = tpu.iota {dimensions = array<i32: 0>} : vector<27x256xi32>
    %cst_25 = arith.constant 0.000000e+00 : f32
    %87 = vector.broadcast %cst_25 : f32 to vector<27x256xf32>
    %c0_i32 = arith.constant 0 : i32
    %88 = vector.broadcast %c0_i32 : i32 to vector<1x256xi32>
    %89 = arith.addi %88, %11 : vector<1x256xi32>
    %90 = vector.broadcast %89 : vector<1x256xi32> to vector<27x256xi32>
    %91 = arith.cmpi eq, %86, %90 : vector<27x256xi32>
    %cst_26 = arith.constant 1.000000e+00 : f32
    %92 = vector.broadcast %cst_26 : f32 to vector<1x256xf32>
    %93 = arith.subf %92, %6 : vector<1x256xf32>
    %cst_27 = arith.constant 0.000000e+00 : f32
    %94 = vector.shape_cast %93 : vector<1x256xf32> to vector<1x256xf32>
    %95 = vector.broadcast %94 : vector<1x256xf32> to vector<27x256xf32>
    %96 = vector.broadcast %cst_27 : f32 to vector<27x256xf32>
    %97 = arith.select %91, %95, %96 : vector<27x256xi1>, vector<27x256xf32>
    %98 = arith.addf %87, %97 : vector<27x256xf32>
    %c0_i32_28 = arith.constant 0 : i32
    %99 = vector.broadcast %c0_i32_28 : i32 to vector<1x256xi32>
    %100 = arith.addi %99, %11 : vector<1x256xi32>
    %c1_i32_29 = arith.constant 1 : i32
    %101 = vector.broadcast %c1_i32_29 : i32 to vector<1x256xi32>
    %102 = arith.addi %100, %101 : vector<1x256xi32>
    %103 = vector.broadcast %102 : vector<1x256xi32> to vector<27x256xi32>
    %104 = arith.cmpi eq, %86, %103 : vector<27x256xi32>
    %cst_30 = arith.constant 0.000000e+00 : f32
    %105 = vector.shape_cast %6 : vector<1x256xf32> to vector<1x256xf32>
    %106 = vector.broadcast %105 : vector<1x256xf32> to vector<27x256xf32>
    %107 = vector.broadcast %cst_30 : f32 to vector<27x256xf32>
    %108 = arith.select %104, %106, %107 : vector<27x256xi1>, vector<27x256xf32>
    %109 = arith.addf %98, %108 : vector<27x256xf32>
    %c9_i32_31 = arith.constant 9 : i32
    %110 = vector.broadcast %c9_i32_31 : i32 to vector<1x256xi32>
    %111 = arith.addi %110, %11 : vector<1x256xi32>
    %112 = vector.broadcast %111 : vector<1x256xi32> to vector<27x256xi32>
    %113 = arith.cmpi eq, %86, %112 : vector<27x256xi32>
    %cst_32 = arith.constant 1.000000e+00 : f32
    %114 = vector.broadcast %cst_32 : f32 to vector<1x256xf32>
    %115 = arith.subf %114, %6 : vector<1x256xf32>
    %cst_33 = arith.constant 0.000000e+00 : f32
    %116 = vector.shape_cast %115 : vector<1x256xf32> to vector<1x256xf32>
    %117 = vector.broadcast %116 : vector<1x256xf32> to vector<27x256xf32>
    %118 = vector.broadcast %cst_33 : f32 to vector<27x256xf32>
    %119 = arith.select %113, %117, %118 : vector<27x256xi1>, vector<27x256xf32>
    %120 = arith.addf %109, %119 : vector<27x256xf32>
    %c9_i32_34 = arith.constant 9 : i32
    %121 = vector.broadcast %c9_i32_34 : i32 to vector<1x256xi32>
    %122 = arith.addi %121, %11 : vector<1x256xi32>
    %c1_i32_35 = arith.constant 1 : i32
    %123 = vector.broadcast %c1_i32_35 : i32 to vector<1x256xi32>
    %124 = arith.addi %122, %123 : vector<1x256xi32>
    %125 = vector.broadcast %124 : vector<1x256xi32> to vector<27x256xi32>
    %126 = arith.cmpi eq, %86, %125 : vector<27x256xi32>
    %cst_36 = arith.constant 0.000000e+00 : f32
    %127 = vector.shape_cast %6 : vector<1x256xf32> to vector<1x256xf32>
    %128 = vector.broadcast %127 : vector<1x256xf32> to vector<27x256xf32>
    %129 = vector.broadcast %cst_36 : f32 to vector<27x256xf32>
    %130 = arith.select %126, %128, %129 : vector<27x256xi1>, vector<27x256xf32>
    %131 = arith.addf %120, %130 : vector<27x256xf32>
    %c18_i32 = arith.constant 18 : i32
    %132 = vector.broadcast %c18_i32 : i32 to vector<1x256xi32>
    %133 = arith.addi %132, %11 : vector<1x256xi32>
    %134 = vector.broadcast %133 : vector<1x256xi32> to vector<27x256xi32>
    %135 = arith.cmpi eq, %86, %134 : vector<27x256xi32>
    %cst_37 = arith.constant 1.000000e+00 : f32
    %136 = vector.broadcast %cst_37 : f32 to vector<1x256xf32>
    %137 = arith.subf %136, %6 : vector<1x256xf32>
    %cst_38 = arith.constant 0.000000e+00 : f32
    %138 = vector.shape_cast %137 : vector<1x256xf32> to vector<1x256xf32>
    %139 = vector.broadcast %138 : vector<1x256xf32> to vector<27x256xf32>
    %140 = vector.broadcast %cst_38 : f32 to vector<27x256xf32>
    %141 = arith.select %135, %139, %140 : vector<27x256xi1>, vector<27x256xf32>
    %142 = arith.addf %131, %141 : vector<27x256xf32>
    %c18_i32_39 = arith.constant 18 : i32
    %143 = vector.broadcast %c18_i32_39 : i32 to vector<1x256xi32>
    %144 = arith.addi %143, %11 : vector<1x256xi32>
    %c1_i32_40 = arith.constant 1 : i32
    %145 = vector.broadcast %c1_i32_40 : i32 to vector<1x256xi32>
    %146 = arith.addi %144, %145 : vector<1x256xi32>
    %147 = vector.broadcast %146 : vector<1x256xi32> to vector<27x256xi32>
    %148 = arith.cmpi eq, %86, %147 : vector<27x256xi32>
    %cst_41 = arith.constant 0.000000e+00 : f32
    %149 = vector.shape_cast %6 : vector<1x256xf32> to vector<1x256xf32>
    %150 = vector.broadcast %149 : vector<1x256xf32> to vector<27x256xf32>
    %151 = vector.broadcast %cst_41 : f32 to vector<27x256xf32>
    %152 = arith.select %148, %150, %151 : vector<27x256xi1>, vector<27x256xf32>
    %153 = arith.addf %142, %152 : vector<27x256xf32>
    %154 = arith.mulf %153, %85 : vector<27x256xf32>
    %155 = tpu.iota {dimensions = array<i32: 0>} : vector<3x27xi32>
    %156 = tpu.iota {dimensions = array<i32: 1>} : vector<3x27xi32>
    %c9_i32_42 = arith.constant 9 : i32
    %157 = vector.broadcast %c9_i32_42 : i32 to vector<3x27xi32>
    %158 = arith.muli %155, %157 : vector<3x27xi32>
    %159 = arith.cmpi sge, %156, %158 : vector<3x27xi32>
    %c1_i32_43 = arith.constant 1 : i32
    %160 = vector.broadcast %c1_i32_43 : i32 to vector<3x27xi32>
    %161 = arith.addi %155, %160 : vector<3x27xi32>
    %c9_i32_44 = arith.constant 9 : i32
    %162 = vector.broadcast %c9_i32_44 : i32 to vector<3x27xi32>
    %163 = arith.muli %161, %162 : vector<3x27xi32>
    %164 = arith.cmpi slt, %156, %163 : vector<3x27xi32>
    %165 = arith.andi %159, %164 : vector<3x27xi1>
    %cst_45 = arith.constant 1.000000e+00 : f32
    %cst_46 = arith.constant 0.000000e+00 : f32
    %166 = vector.broadcast %cst_45 : f32 to vector<3x27xf32>
    %167 = vector.broadcast %cst_46 : f32 to vector<3x27xf32>
    %168 = arith.select %165, %166, %167 : vector<3x27xi1>, vector<3x27xf32>
    %cst_47 = arith.constant dense<0.000000e+00> : vector<3x256xf32>
    %169 = tpu.matmul %168, %154, %cst_47 {dimension_numbers = #tpu.dot_dimension_numbers<[1], [0], [0], [1], [0, 0, 1, 1], [], []>} : vector<3x27xf32>, vector<27x256xf32>, vector<3x256xf32> -> vector<3x256xf32>
    %c0_48 = arith.constant 0 : index
    %c0_49 = arith.constant 0 : index
    %c0_50 = arith.constant 0 : index
    %c0_51 = arith.constant 0 : index
    %170 = vector.load %arg5[%c0_48, %c0_49, %c0_50, %c0_51] : memref<1x1x3x256xf32, #tpu.memory_space<vmem>>, vector<1x1x3x256xf32>
    %171 = vector.shape_cast %170 : vector<1x1x3x256xf32> to vector<3x256xf32>
    %172 = vector.shape_cast %169 : vector<3x256xf32> to vector<1x1x3x256xf32>
    tpu.vector_store %arg5[%c0_48, %c0_49, %c0_50, %c0_51], %172 {strides = array<i32>} : memref<1x1x3x256xf32, #tpu.memory_space<vmem>>, vector<1x1x3x256xf32>,
    return
  }
  func.func @transform_0(%arg0: i32, %arg1: i32, %arg2: i32) -> (i32, i32, i32) {
    %c0_i32 = arith.constant 0 : i32
    %c0_i32_0 = arith.constant 0 : i32
    return %arg1, %c0_i32, %arg2 : i32, i32, i32
  }
  func.func @transform_1(%arg0: i32, %arg1: i32, %arg2: i32) -> (i32, i32, i32) {
    %c0_i32 = arith.constant 0 : i32
    %c0_i32_0 = arith.constant 0 : i32
    %c0_i32_1 = arith.constant 0 : i32
    return %arg1, %c0_i32, %c0_i32_0 : i32, i32, i32
  }
  func.func @transform_2(%arg0: i32, %arg1: i32, %arg2: i32) -> (i32, i32, i32, i32) {
    %c0_i32 = arith.constant 0 : i32
    %c0_i32_0 = arith.constant 0 : i32
    return %arg1, %arg0, %c0_i32, %arg2 : i32, i32, i32, i32
  }
}

</mosaic_0001>

<bundles_post_ra>
// kernel: _apply_lut.1
= control target key start
LH: loop header
LB: loop body
LE: loop exit
PB: predicated region body
PF: predicated region fallthrough
CT: control target
= control target key end

     0   :  { %s1379_s9 = smov 0   ;;  %s1381_s10 = smov 0   ;;  %s2013_s0 = inlined_call_operand.vmem [shape: f32[2,3,256], index: 0, kind: input, shape index: {}]   ;;  %s2014_s1 = inlined_call_operand.vmem [shape: f32[2,27,81], index: 1, kind: input, shape index: {}]   ;;  %s2015_s2 = inlined_call_operand.vmem [shape: f32[2,1,3,256], index: 2, kind: output, shape index: {}]  }
   0x1   :  { %s1383_s11 = smov 0  }
   0x2 LB: > { %s27_s12 = sadd.s32 1, %s1356_s10  ;;  %p1259_p0 = scmp.ge.s32.totalorder %s1360_s11, 1  ;;  %s1360_s11 = sphi %s1383_s11, %s12_s11   ;;  %s1356_s10 = sphi %s1381_s10, %s2017_s10   ;;  %s1352_s9 = sphi %s1379_s9, %s2016_s9  }
   0x3   : > { %p29_p1 = scmp.ge.s32.totalorder %s27_s12, 2  ;;  %p152_p2 = scmp.lt.s32.totalorder %s1360_s11, 3 }
   0x5   : > { %s2019_s12 = smov (%p29_p1, %s27_s12), 0  ;;  %p153_p3 = pnand %p1259_p0, %p152_p2 }
   0x6   : > { %p192_p4 = scmp.lt.s32.totalorder (!%p153_p3), %s1352_s9, 1  ;;  %v1362_v0 = vmov (!%p153_p3), 0.0   ;;  %v228_v2 = vlaneseq (!%p153_p3) }
   0x7   : > { %156 = sbr.rel (%p153_p3) target bundleno = 557 (0x22d), region = 28  ;;  %727 = vmatprep.mubr.f32.mxu0 (!%p153_p3), %v1362_v0  ;;  %1125 = vmatprep.mubr.f32.mxu1 (!%p153_p3), %v1362_v0 }
   0x8   : > { %v1408_v5 = vshrl.u32 (!%p153_p3), %v228_v2, 7 }
   0xa   : > { %v1417_v11 = vsub.s32 (!%p153_p3), 2, %v1408_v5  ;;  %v1420_v12 = vsub.s32 (!%p153_p3), 6, %v1408_v5  ;;  %v1426_v17 = vadd.s32 (!%p153_p3), 8, %v1408_v5  ;;  %v1429_v18 = vadd.s32 (!%p153_p3), 16, %v1408_v5 }
   0xb   : > { %v1432_v19 = vadd.s32 (!%p153_p3), 24, %v1408_v5  ;;  %v1439_v23 = vadd.s32 (!%p153_p3), 32, %v1408_v5  ;;  %v1445_v27 = vadd.s32 (!%p153_p3), 40, %v1408_v5  ;;  %v1450_v30 = vadd.s32 (!%p153_p3), 48, %v1408_v5 }
   0xc   : > { %v1453_v31 = vadd.s32 (!%p153_p3), 56, %v1408_v5  ;;  %v1460_v37 = vadd.s32 (!%p153_p3), 64, %v1408_v5  ;;  %v1463_v38 = vadd.s32 (!%p153_p3), 72, %v1408_v5  ;;  %v1466_v39 = vadd.s32 (!%p153_p3), 80, %v1408_v5 }
   0xe   : > { %s2021_s9 = smov (!%p192_p4, %s1352_s9), 1 }
   0xf   : > { %s1277_s13 = sshll.u32 %s2021_s9, 3  ;;  %s1278_s17 = sshll.u32 %s2021_s9, 5 }
  0x10   : > { %s199_s16 = scalar_lea.vmem %s2013_s0, %s1277_s13  ;;  %s205_s20 = scalar_lea.vmem %s2014_s1, %s1278_s17 }
  0x11   : > { %v220_v1 = vld [vmem:[%s199_s16] sm:$0x77]  ;;  %s218_s23 = scalar_lea.vmem %s2015_s2, %s1277_s13 }
  0x12   : > { %v222_v3 = vmul.f32 7.9999924, %v220_v1 }
  0x14   : > { %v223_v4 = vfloor.f32 %v222_v3 }
  0x16   : > { %v1410_v6 = vsub.f32 %v222_v3, %v223_v4  ;;  %v225_v7 = vmax.f32 %v223_v4, 0.0 }
  0x18   : > { %v226_v8 = vmin.f32 %v225_v7, 7.0  ;;  %v1413_v9 = vsub.f32 1.0, %v1410_v6  ;;  %v249_v10 = vrot.slane %v1410_v6, 7 }
  0x1a   : > { %v1310_v13 = vtrunc.f32 %v226_v8  ;;  %v245_v14 = vrot.slane %v1413_v9, 7  ;;  %v251_v15 = vmul.f32 %v249_v10, %v1413_v9  ;;  %v253_v16 = vmul.f32 %v249_v10, %v1410_v6 }
  0x1c   : > { %v1434_v20 = vcvt.f32.s32 %v1310_v13  ;;  %v247_v21 = vmul.f32 %v245_v14, %v1413_v9  ;;  %v252_v22 = vmul.f32 %v245_v14, %v1410_v6  ;;  %v380_v24 = vrot.slane %v251_v15, %v1420_v12 }
  0x1d   : > { %v584_v25 = vrot.slane %v253_v16, %v1420_v12  ;;  %v376_v26 = vrot.slane %v251_v15, %v1417_v11  ;;  %v580_v35 = vrot.slane %v253_v16, %v1417_v11 }
  0x1e   : > { %v240_v28 = vmul.u32 9, %v1434_v20  ;;  %v241_v29 = vrot.slane %v1434_v20, 7  ;;  %v300_v32 = vrot.slane %v247_v21, %v1420_v12  ;;  %v482_v33 = vrot.slane %v252_v22, %v1420_v12 }
  0x1f   : > { %v296_v34 = vrot.slane %v247_v21, %v1417_v11  ;;  %v1469_v40 = vrot.slane %v380_v24, %v1417_v11  ;;  %v1472_v41 = vrot.slane %v584_v25, %v1417_v11  ;;  %v1475_v42 = vrot.slane %v376_v26, %v1417_v11 }
  0x20   : > { %v242_v36 = vadd.s32 %v241_v29, %v240_v28  ;;  %v478_v43 = vrot.slane %v252_v22, %v1417_v11  ;;  %v1481_v48 = vrot.slane %v300_v32, %v1417_v11  ;;  %v1484_v49 = vrot.slane %v482_v33, %v1417_v11 }
  0x21   : > { %v1487_v50 = vrot.slane %v296_v34, %v1417_v11  ;;  %v1490_v51 = vrot.slane %v580_v35, %v1417_v11 }
  0x22   : > { %v261_v44 = vrot.slane %v242_v36, %v1420_v12  ;;  %v333_v45 = vadd.s32 1, %v242_v36  ;;  %v435_v46 = vadd.s32 9, %v242_v36  ;;  %v257_v47 = vrot.slane %v242_v36, %v1417_v11 }
  0x23   : > { %v1503_v59 = vrot.slane %v478_v43, %v1417_v11 }
  0x24   : > { %v1493_v52 = vrot.slane %v261_v44, %v1417_v11  ;;  %v341_v53 = vrot.slane %v333_v45, %v1420_v12  ;;  %v443_v54 = vrot.slane %v435_v46, %v1420_v12  ;;  %v537_v55 = vadd.s32 1, %v435_v46 }
  0x25   : > { %v1498_v56 = vrot.slane %v257_v47, %v1417_v11  ;;  %v337_v57 = vrot.slane %v333_v45, %v1417_v11  ;;  %v439_v58 = vrot.slane %v435_v46, %v1417_v11 }
  0x26   : > { %vm271_vm0 = vcmp.eq.s32.totalorder %v1408_v5, %v1493_v52  ;;  %vm273_vm1 = vcmp.eq.s32.totalorder %v1426_v17, %v1493_v52  ;;  %v1510_v60 = vrot.slane %v341_v53, %v1417_v11  ;;  %v1513_v61 = vrot.slane %v443_v54, %v1417_v11 }
  0x27   : > { %v312_v62 = vsel %vm271_vm0, %v1481_v48, 0.0  ;;  %v314_v63 = vsel %vm273_vm1, %v1481_v48, 0.0  ;;  %v545_v1 = vrot.slane %v537_v55, %v1420_v12  ;;  %vm270_vm2 = vcmp.eq.s32.totalorder %v1408_v5, %v1498_v56 }
  0x28   : > { %vm351_vm3 = vcmp.eq.s32.totalorder %v1408_v5, %v1510_v60  ;;  %vm353_vm4 = vcmp.eq.s32.totalorder %v1426_v17, %v1510_v60  ;;  %vm453_vm5 = vcmp.eq.s32.totalorder %v1408_v5, %v1513_v61  ;;  %vm455_vm6 = vcmp.eq.s32.totalorder %v1426_v17, %v1513_v61 }
  0x29   : > { %v392_v3 = vsel %vm351_vm3, %v1469_v40, 0.0  ;;  %v394_v4 = vsel %vm353_vm4, %v1469_v40, 0.0  ;;  %v494_v7 = vsel %vm453_vm5, %v1484_v49, 0.0  ;;  %v496_v8 = vsel %vm455_vm6, %v1484_v49, 0.0 }
  0x2a   : > { %v414_v10 = vadd.f32 %v392_v3, %v312_v62  ;;  %v416_v12 = vadd.f32 %v394_v4, %v314_v63  ;;  %v1533_v13 = vrot.slane %v545_v1, %v1417_v11  ;;  %vm272_vm7 = vcmp.eq.s32.totalorder %v1426_v17, %v1498_v56 }
  0x2b   : > { %v311_v14 = vsel %vm270_vm2, %v1487_v50, 0.0  ;;  %v313_v15 = vsel %vm272_vm7, %v1487_v50, 0.0  ;;  %v1540_v16 = vrot.slane %v337_v57, %v1417_v11  ;;  %v1543_v21 = vrot.slane %v439_v58, %v1417_v11 }
  0x2c   : > { %v516_v22 = vadd.f32 %v494_v7, %v414_v10  ;;  %v518_v24 = vadd.f32 %v496_v8, %v416_v12  ;;  %vm555_vm8 = vcmp.eq.s32.totalorder %v1408_v5, %v1533_v13  ;;  %vm557_vm9 = vcmp.eq.s32.totalorder %v1426_v17, %v1533_v13 }
  0x2d   : > { %v596_v25 = vsel %vm555_vm8, %v1472_v41, 0.0  ;;  %v598_v26 = vsel %vm557_vm9, %v1472_v41, 0.0  ;;  %vm350_vm10 = vcmp.eq.s32.totalorder %v1408_v5, %v1540_v16  ;;  %vm352_vm11 = vcmp.eq.s32.totalorder %v1426_v17, %v1540_v16 }
  0x2e   : > { %v618_v28 = vadd.f32 %v596_v25, %v516_v22  ;;  %v620_v29 = vadd.f32 %v598_v26, %v518_v24  ;;  %v391_v32 = vsel %vm350_vm10, %v1475_v42, 0.0  ;;  %v393_v33 = vsel %vm352_vm11, %v1475_v42, 0.0 }
  0x2f   : > { %v413_v34 = vadd.f32 %v391_v32, %v311_v14  ;;  %v415_v35 = vadd.f32 %v393_v33, %v313_v15  ;;  %vm452_vm12 = vcmp.eq.s32.totalorder %v1408_v5, %v1543_v21  ;;  %vm454_vm13 = vcmp.eq.s32.totalorder %v1426_v17, %v1543_v21 }
  0x30   : > { %v1280_v36 = vpack.c.bf16 %v620_v29, %v618_v28  ;;  %v493_v43 = vsel %vm452_vm12, %v1503_v59, 0.0  ;;  %v495_v44 = vsel %vm454_vm13, %v1503_v59, 0.0  ;;  %v541_v45 = vrot.slane %v537_v55, %v1417_v11 }
  0x31   : > { %v515_v46 = vadd.f32 %v493_v43, %v413_v34  ;;  %v517_v47 = vadd.f32 %v495_v44, %v415_v35  ;;  %vm275_vm14 = vcmp.eq.s32.totalorder %v1429_v18, %v1493_v52  ;;  %vm277_vm15 = vcmp.eq.s32.totalorder %v1432_v19, %v1493_v52 }
  0x32   : > { %1281 = vmatprep.subr.bf16.mxu0 %v1280_v36  ;;  %v1569_v53 = vrot.slane %v541_v45, %v1417_v11  ;;  %v316_v54 = vsel %vm275_vm14, %v1481_v48, 0.0  ;;  %v318_v57 = vsel %vm277_vm15, %v1481_v48, 0.0  ;;  %vm355_vm0 = vcmp.eq.s32.totalorder %v1429_v18, %v1510_v60 }
  0x33   : > { %vm357_vm1 = vcmp.eq.s32.totalorder %v1432_v19, %v1510_v60  ;;  %v396_v55 = vsel %vm355_vm0, %v1469_v40, 0.0  ;;  %vm457_vm2 = vcmp.eq.s32.totalorder %v1429_v18, %v1513_v61  ;;  %vm459_vm3 = vcmp.eq.s32.totalorder %v1432_v19, %v1513_v61 }
  0x34   : > { %vm554_vm4 = vcmp.eq.s32.totalorder %v1408_v5, %v1569_v53  ;;  %vm556_vm5 = vcmp.eq.s32.totalorder %v1426_v17, %v1569_v53  ;;  %v398_v11 = vsel %vm357_vm1, %v1469_v40, 0.0  ;;  %v418_v58 = vadd.f32 %v396_v55, %v316_v54 }
  0x35   : > { %v595_v62 = vsel %vm554_vm4, %v1490_v51, 0.0  ;;  %v597_v63 = vsel %vm556_vm5, %v1490_v51, 0.0  ;;  %v420_v1 = vadd.f32 %v398_v11, %v318_v57  ;;  %v498_v3 = vsel %vm457_vm2, %v1484_v49, 0.0 }
  0x36   : > { %v617_v4 = vadd.f32 %v595_v62, %v515_v46  ;;  %v619_v7 = vadd.f32 %v597_v63, %v517_v47  ;;  %v500_v8 = vsel %vm459_vm3, %v1484_v49, 0.0  ;;  %v520_v10 = vadd.f32 %v498_v3, %v418_v58 }
  0x37   : > { %v522_v12 = vadd.f32 %v500_v8, %v420_v1  ;;  %vm559_vm6 = vcmp.eq.s32.totalorder %v1429_v18, %v1533_v13  ;;  %vm561_vm7 = vcmp.eq.s32.totalorder %v1432_v19, %v1533_v13  ;;  %vm274_vm8 = vcmp.eq.s32.totalorder %v1429_v18, %v1498_v56 }
  0x38   : > { %v1282_v14 = vpack.c.bf16 %v619_v7, %v617_v4  ;;  %v600_v15 = vsel %vm559_vm6, %v1472_v41, 0.0  ;;  %v602_v22 = vsel %vm561_vm7, %v1472_v41, 0.0  ;;  %vm276_vm9 = vcmp.eq.s32.totalorder %v1432_v19, %v1498_v56 }
  0x39   : > { %v622_v24 = vadd.f32 %v600_v15, %v520_v10  ;;  %v624_v25 = vadd.f32 %v602_v22, %v522_v12  ;;  %v315_v26 = vsel %vm274_vm8, %v1487_v50, 0.0  ;;  %v317_v28 = vsel %vm276_vm9, %v1487_v50, 0.0 }
  0x3a   : > { %1283 = vmatpush1.bf16.msra.mxu0 %v1282_v14  ;;  %vm354_vm10 = vcmp.eq.s32.totalorder %v1429_v18, %v1540_v16  ;;  %vm356_vm11 = vcmp.eq.s32.totalorder %v1432_v19, %v1540_v16  ;;  %vm456_vm12 = vcmp.eq.s32.totalorder %v1429_v18, %v1543_v21  ;;  %vm458_vm13 = vcmp.eq.s32.totalorder %v1432_v19, %v1543_v21 }
  0x3b   : > { %v1284_v29 = vpack.c.bf16 %v624_v25, %v622_v24  ;;  %v395_v32 = vsel %vm354_vm10, %v1475_v42, 0.0  ;;  %v397_v33 = vsel %vm356_vm11, %v1475_v42, 0.0  ;;  %v497_v34 = vsel %vm456_vm12, %v1503_v59, 0.0 }
  0x3c   : > { %v417_v35 = vadd.f32 %v395_v32, %v315_v26  ;;  %v419_v36 = vadd.f32 %v397_v33, %v317_v28  ;;  %v499_v43 = vsel %vm458_vm13, %v1503_v59, 0.0  ;;  %vm558_vm14 = vcmp.eq.s32.totalorder %v1429_v18, %v1569_v53 }
  0x3d   : > { %1285 = vmatprep.subr.bf16.mxu0 %v1284_v29  ;;  %vm560_vm15 = vcmp.eq.s32.totalorder %v1432_v19, %v1569_v53  ;;  %v599_v44 = vsel %vm558_vm14, %v1490_v51, 0.0  ;;  %vm279_vm0 = vcmp.eq.s32.totalorder %v1439_v23, %v1493_v52  ;;  %vm281_vm1 = vcmp.eq.s32.totalorder %v1445_v27, %v1493_v52 }
  0x3e   : > { %v519_v45 = vadd.f32 %v497_v34, %v417_v35  ;;  %v521_v46 = vadd.f32 %v499_v43, %v419_v36  ;;  %v601_v47 = vsel %vm560_vm15, %v1490_v51, 0.0  ;;  %v320_v54 = vsel %vm279_vm0, %v1481_v48, 0.0 }
  0x3f   : > { %v322_v57 = vsel %vm281_vm1, %v1481_v48, 0.0  ;;  %vm359_vm2 = vcmp.eq.s32.totalorder %v1439_v23, %v1510_v60  ;;  %vm361_vm3 = vcmp.eq.s32.totalorder %v1445_v27, %v1510_v60  ;;  %vm461_vm4 = vcmp.eq.s32.totalorder %v1439_v23, %v1513_v61 }
  0x40   : > { %v621_v55 = vadd.f32 %v599_v44, %v519_v45  ;;  %v623_v11 = vadd.f32 %v601_v47, %v521_v46  ;;  %v400_v58 = vsel %vm359_vm2, %v1469_v40, 0.0  ;;  %v402_v62 = vsel %vm361_vm3, %v1469_v40, 0.0 }
  0x41   : > { %v422_v63 = vadd.f32 %v400_v58, %v320_v54  ;;  %v424_v1 = vadd.f32 %v402_v62, %v322_v57  ;;  %vm463_vm5 = vcmp.eq.s32.totalorder %v1445_v27, %v1513_v61  ;;  %v502_v3 = vsel %vm461_vm4, %v1484_v49, 0.0 }
  0x42   : > { %v1286_v4 = vpack.c.bf16 %v623_v11, %v621_v55  ;;  %v504_v7 = vsel %vm463_vm5, %v1484_v49, 0.0  ;;  %vm563_vm6 = vcmp.eq.s32.totalorder %v1439_v23, %v1533_v13  ;;  %vm565_vm7 = vcmp.eq.s32.totalorder %v1445_v27, %v1533_v13 }
  0x43   : > { %v524_v8 = vadd.f32 %v502_v3, %v422_v63  ;;  %v526_v10 = vadd.f32 %v504_v7, %v424_v1  ;;  %v604_v12 = vsel %vm563_vm6, %v1472_v41, 0.0  ;;  %v606_v14 = vsel %vm565_vm7, %v1472_v41, 0.0 }
  0x44   : > { %1287 = vmatpush1.bf16.msra.mxu0 %v1286_v4  ;;  %vm278_vm8 = vcmp.eq.s32.totalorder %v1439_v23, %v1498_v56  ;;  %vm280_vm9 = vcmp.eq.s32.totalorder %v1445_v27, %v1498_v56  ;;  %vm358_vm10 = vcmp.eq.s32.totalorder %v1439_v23, %v1540_v16  ;;  %vm360_vm11 = vcmp.eq.s32.totalorder %v1445_v27, %v1540_v16 }
  0x45   : > { %v626_v15 = vadd.f32 %v604_v12, %v524_v8  ;;  %v628_v22 = vadd.f32 %v606_v14, %v526_v10  ;;  %v319_v24 = vsel %vm278_vm8, %v1487_v50, 0.0  ;;  %v321_v25 = vsel %vm280_vm9, %v1487_v50, 0.0 }
  0x46   : > { %v399_v26 = vsel %vm358_vm10, %v1475_v42, 0.0  ;;  %v401_v28 = vsel %vm360_vm11, %v1475_v42, 0.0  ;;  %vm460_vm12 = vcmp.eq.s32.totalorder %v1439_v23, %v1543_v21  ;;  %vm462_vm13 = vcmp.eq.s32.totalorder %v1445_v27, %v1543_v21 }
  0x47   : > { %v1288_v29 = vpack.c.bf16 %v628_v22, %v626_v15  ;;  %v421_v32 = vadd.f32 %v399_v26, %v319_v24  ;;  %v423_v33 = vadd.f32 %v401_v28, %v321_v25  ;;  %v501_v34 = vsel %vm460_vm12, %v1503_v59, 0.0 }
  0x48   : > { %v503_v35 = vsel %vm462_vm13, %v1503_v59, 0.0  ;;  %vm562_vm14 = vcmp.eq.s32.totalorder %v1439_v23, %v1569_v53  ;;  %vm564_vm15 = vcmp.eq.s32.totalorder %v1445_v27, %v1569_v53  ;;  %vm283_vm0 = vcmp.eq.s32.totalorder %v1450_v30, %v1493_v52 }
  0x49   : > { %1289 = vmatprep.subr.bf16.mxu0 %v1288_v29  ;;  %v523_v36 = vadd.f32 %v501_v34, %v421_v32  ;;  %v525_v43 = vadd.f32 %v503_v35, %v423_v33  ;;  %v603_v44 = vsel %vm562_vm14, %v1490_v51, 0.0  ;;  %v605_v45 = vsel %vm564_vm15, %v1490_v51, 0.0 }
  0x4a   : > { %vm285_vm1 = vcmp.eq.s32.totalorder %v1453_v31, %v1493_v52  ;;  %v324_v46 = vsel %vm283_vm0, %v1481_v48, 0.0  ;;  %vm363_vm2 = vcmp.eq.s32.totalorder %v1450_v30, %v1510_v60  ;;  %vm365_vm3 = vcmp.eq.s32.totalorder %v1453_v31, %v1510_v60 }
  0x4b   : > { %v625_v23 = vadd.f32 %v603_v44, %v523_v36  ;;  %v627_v27 = vadd.f32 %v605_v45, %v525_v43  ;;  %v326_v47 = vsel %vm285_vm1, %v1481_v48, 0.0  ;;  %v404_v54 = vsel %vm363_vm2, %v1469_v40, 0.0 }
  0x4c   : > { %v406_v57 = vsel %vm365_vm3, %v1469_v40, 0.0  ;;  %v426_v55 = vadd.f32 %v404_v54, %v324_v46  ;;  %vm465_vm4 = vcmp.eq.s32.totalorder %v1450_v30, %v1513_v61  ;;  %vm467_vm5 = vcmp.eq.s32.totalorder %v1453_v31, %v1513_v61 }
  0x4d   : > { %v1290_v11 = vpack.c.bf16 %v627_v27, %v625_v23  ;;  %v428_v58 = vadd.f32 %v406_v57, %v326_v47  ;;  %v506_v62 = vsel %vm465_vm4, %v1484_v49, 0.0  ;;  %v508_v63 = vsel %vm467_vm5, %v1484_v49, 0.0 }
  0x4e   : > { %v528_v1 = vadd.f32 %v506_v62, %v426_v55  ;;  %vm567_vm6 = vcmp.eq.s32.totalorder %v1450_v30, %v1533_v13  ;;  %vm569_vm7 = vcmp.eq.s32.totalorder %v1453_v31, %v1533_v13  ;;  %vm282_vm8 = vcmp.eq.s32.totalorder %v1450_v30, %v1498_v56 }
  0x4f   : > { %1291 = vmatpush1.bf16.msra.mxu0 %v1290_v11  ;;  %v530_v3 = vadd.f32 %v508_v63, %v428_v58  ;;  %v608_v4 = vsel %vm567_vm6, %v1472_v41, 0.0  ;;  %v610_v7 = vsel %vm569_vm7, %v1472_v41, 0.0  ;;  %vm284_vm9 = vcmp.eq.s32.totalorder %v1453_v31, %v1498_v56 }
  0x50   : > { %v630_v8 = vadd.f32 %v608_v4, %v528_v1  ;;  %v323_v10 = vsel %vm282_vm8, %v1487_v50, 0.0  ;;  %v325_v12 = vsel %vm284_vm9, %v1487_v50, 0.0  ;;  %vm362_vm10 = vcmp.eq.s32.totalorder %v1450_v30, %v1540_v16 }
  0x51   : > { %v632_v14 = vadd.f32 %v610_v7, %v530_v3  ;;  %vm364_vm11 = vcmp.eq.s32.totalorder %v1453_v31, %v1540_v16  ;;  %v403_v15 = vsel %vm362_vm10, %v1475_v42, 0.0  ;;  %vm464_vm12 = vcmp.eq.s32.totalorder %v1450_v30, %v1543_v21 }
  0x52   : > { %v405_v22 = vsel %vm364_vm11, %v1475_v42, 0.0  ;;  %v425_v24 = vadd.f32 %v403_v15, %v323_v10  ;;  %vm466_vm13 = vcmp.eq.s32.totalorder %v1453_v31, %v1543_v21  ;;  %v505_v25 = vsel %vm464_vm12, %v1503_v59, 0.0 }
  0x53   : > { %v1292_v26 = vpack.c.bf16 %v632_v14, %v630_v8  ;;  %v427_v28 = vadd.f32 %v405_v22, %v325_v12  ;;  %v507_v29 = vsel %vm466_vm13, %v1503_v59, 0.0  ;;  %vm566_vm14 = vcmp.eq.s32.totalorder %v1450_v30, %v1569_v53 }
  0x54   : > { %v527_v32 = vadd.f32 %v505_v25, %v425_v24  ;;  %vm568_vm15 = vcmp.eq.s32.totalorder %v1453_v31, %v1569_v53  ;;  %v607_v33 = vsel %vm566_vm14, %v1490_v51, 0.0  ;;  %vm287_vm0 = vcmp.eq.s32.totalorder %v1460_v37, %v1493_v52 }
  0x55   : > { %1293 = vmatprep.subr.bf16.mxu0 %v1292_v26  ;;  %v529_v34 = vadd.f32 %v507_v29, %v427_v28  ;;  %v609_v35 = vsel %vm568_vm15, %v1490_v51, 0.0  ;;  %vm289_vm1 = vcmp.eq.s32.totalorder %v1463_v38, %v1493_v52  ;;  %v328_v36 = vsel %vm287_vm0, %v1481_v48, 0.0 }
  0x56   : > { %v629_v43 = vadd.f32 %v607_v33, %v527_v32  ;;  %v330_v30 = vsel %vm289_vm1, %v1481_v48, 0.0  ;;  %vm367_vm2 = vcmp.eq.s32.totalorder %v1460_v37, %v1510_v60  ;;  %vm369_vm3 = vcmp.eq.s32.totalorder %v1463_v38, %v1510_v60 }
  0x57   : > { %v631_v31 = vadd.f32 %v609_v35, %v529_v34  ;;  %v408_v44 = vsel %vm367_vm2, %v1469_v40, 0.0  ;;  %v410_v45 = vsel %vm369_vm3, %v1469_v40, 0.0  ;;  %vm469_vm4 = vcmp.eq.s32.totalorder %v1460_v37, %v1513_v61 }
  0x58   : > { %v430_v46 = vadd.f32 %v408_v44, %v328_v36  ;;  %v432_v23 = vadd.f32 %v410_v45, %v330_v30  ;;  %vm471_vm5 = vcmp.eq.s32.totalorder %v1463_v38, %v1513_v61  ;;  %v510_v27 = vsel %vm469_vm4, %v1484_v49, 0.0 }
  0x59   : > { %v1294_v47 = vpack.c.bf16 %v631_v31, %v629_v43  ;;  %v512_v54 = vsel %vm471_vm5, %v1484_v49, 0.0  ;;  %vm571_vm6 = vcmp.eq.s32.totalorder %v1460_v37, %v1533_v13  ;;  %vm573_vm7 = vcmp.eq.s32.totalorder %v1463_v38, %v1533_v13 }
  0x5a   : > { %v532_v57 = vadd.f32 %v510_v27, %v430_v46  ;;  %v534_v55 = vadd.f32 %v512_v54, %v432_v23  ;;  %v612_v11 = vsel %vm571_vm6, %v1472_v41, 0.0  ;;  %v614_v58 = vsel %vm573_vm7, %v1472_v41, 0.0 }
  0x5b   : > { %1295 = vmatpush1.bf16.msra.mxu0 %v1294_v47  ;;  %vm286_vm8 = vcmp.eq.s32.totalorder %v1460_v37, %v1498_v56  ;;  %vm288_vm9 = vcmp.eq.s32.totalorder %v1463_v38, %v1498_v56  ;;  %vm366_vm10 = vcmp.eq.s32.totalorder %v1460_v37, %v1540_v16  ;;  %vm368_vm11 = vcmp.eq.s32.totalorder %v1463_v38, %v1540_v16 }
  0x5c   : > { %v634_v62 = vadd.f32 %v612_v11, %v532_v57  ;;  %v636_v63 = vadd.f32 %v614_v58, %v534_v55  ;;  %v327_v1 = vsel %vm286_vm8, %v1487_v50, 0.0  ;;  %v329_v3 = vsel %vm288_vm9, %v1487_v50, 0.0 }
  0x5d   : > { %v407_v4 = vsel %vm366_vm10, %v1475_v42, 0.0  ;;  %v409_v7 = vsel %vm368_vm11, %v1475_v42, 0.0  ;;  %vm468_vm12 = vcmp.eq.s32.totalorder %v1460_v37, %v1543_v21  ;;  %vm470_vm13 = vcmp.eq.s32.totalorder %v1463_v38, %v1543_v21 }
  0x5e   : > { %v1296_v8 = vpack.c.bf16 %v636_v63, %v634_v62  ;;  %v429_v10 = vadd.f32 %v407_v4, %v327_v1  ;;  %v431_v12 = vadd.f32 %v409_v7, %v329_v3  ;;  %v509_v14 = vsel %vm468_vm12, %v1503_v59, 0.0 }
  0x5f   : > { %v511_v15 = vsel %vm470_vm13, %v1503_v59, 0.0  ;;  %vm570_vm14 = vcmp.eq.s32.totalorder %v1460_v37, %v1569_v53  ;;  %vm572_vm15 = vcmp.eq.s32.totalorder %v1463_v38, %v1569_v53  ;;  %vm291_vm0 = vcmp.eq.s32.totalorder %v1466_v39, %v1493_v52 }
  0x60   : > { %1297 = vmatprep.subr.bf16.mxu0 %v1296_v8  ;;  %v531_v22 = vadd.f32 %v509_v14, %v429_v10  ;;  %v533_v24 = vadd.f32 %v511_v15, %v431_v12  ;;  %v611_v25 = vsel %vm570_vm14, %v1490_v51, 0.0  ;;  %v613_v26 = vsel %vm572_vm15, %v1490_v51, 0.0 }
  0x61   : > { %v332_v28 = vsel %vm291_vm0, %v1481_v48, 0.0  ;;  %vm371_vm1 = vcmp.eq.s32.totalorder %v1466_v39, %v1510_v60  ;;  %vm473_vm2 = vcmp.eq.s32.totalorder %v1466_v39, %v1513_v61  ;;  %vm575_vm3 = vcmp.eq.s32.totalorder %v1466_v39, %v1533_v13 }
  0x62   : > { %v633_v37 = vadd.f32 %v611_v25, %v531_v22  ;;  %v635_v38 = vadd.f32 %v613_v26, %v533_v24  ;;  %v412_v52 = vsel %vm371_vm1, %v1469_v40, 0.0  ;;  %v514_v29 = vsel %vm473_vm2, %v1484_v49, 0.0 }
  0x63   : > { %v434_v32 = vadd.f32 %v412_v52, %v332_v28  ;;  %v616_v33 = vsel %vm575_vm3, %v1472_v41, 0.0  ;;  %vm290_vm4 = vcmp.eq.s32.totalorder %v1466_v39, %v1498_v56  ;;  %vm370_vm5 = vcmp.eq.s32.totalorder %v1466_v39, %v1540_v16  ;;  %v639_v16 = vld [vmem:[%s205_s20] sm:$0xff] }
  0x64   : > { %v1298_v48 = vpack.c.bf16 %v635_v38, %v633_v37  ;;  %v331_v60 = vsel %vm290_vm4, %v1487_v50, 0.0  ;;  %v411_v61 = vsel %vm370_vm5, %v1475_v42, 0.0  ;;  %vm472_vm6 = vcmp.eq.s32.totalorder %v1466_v39, %v1543_v21 }
  0x65   : > { %v536_v40 = vadd.f32 %v514_v29, %v434_v32  ;;  %v433_v49 = vadd.f32 %v411_v61, %v331_v60  ;;  %v513_v13 = vsel %vm472_vm6, %v1503_v59, 0.0  ;;  %vm574_vm7 = vcmp.eq.s32.totalorder %v1466_v39, %v1569_v53  ;;  %v640_v59 = vld [vmem:[%s205_s20 + $0x8] sm:$0xff]  ;;  %v641_v39 = vld [vmem:[%s205_s20 + $0x10] sm:$0xff] }
  0x66   : > { %1299 = vmatpush1.bf16.msra.mxu0 %v1298_v48  ;;  %vm656_vm8 = vcmask 1040384   ;;  %v615_v41 = vsel %vm574_vm7, %v1490_v51, 0.0  ;;  %vm643_vm9 = vcmask 662528   ;;  %v642_v51 = vld [vmem:[%s205_s20 + $0x18] sm:$0x7]  ;;  %v754_v21 = vsub.s32 0, %v1408_v5 }
  0x67   : > { %v638_v50 = vadd.f32 %v616_v33, %v536_v40  ;;  %v535_v42 = vadd.f32 %v513_v13, %v433_v49  ;;  %v810_v53 = vadd.s32 1, %v1434_v20  ;;  %v869_v34 = vadd.s32 9, %v1434_v20 }
  0x68   : > { %v755_v35 = vrot.slane %v1434_v20, %v754_v21  ;;  %v758_v43 = vsub.s32 4, %v1408_v5  ;;  %v779_v30 = vrot.slane %v1413_v9, %v754_v21  ;;  %v838_v31 = vrot.slane %v1410_v6, %v754_v21 }
  0x69   : > { %1266 = vmatprep.subr.msk.mxu0 %vm656_vm8, %v638_v50  ;;  %v637_v56 = vadd.f32 %v615_v41, %v535_v42  ;;  %v814_v36 = vrot.slane %v810_v53, %v754_v21  ;;  %v873_v44 = vrot.slane %v869_v34, %v754_v21  ;;  %v910_v23 = vadd.s32 1, %v869_v34 }
  0x6a   : > { %v1803_v45 = vrot.slane %v755_v35, %v754_v21  ;;  %v759_v27 = vrot.slane %v1434_v20, %v758_v43  ;;  %v818_v47 = vrot.slane %v810_v53, %v758_v43  ;;  %v1808_v54 = vrot.slane %v779_v30, %v754_v21 }
  0x6b   : > { %1267 = vmatpush1.msk.msra.mxu0 %vm656_vm8, %v637_v56  ;;  %v1805_v46 = vrot.slane %v814_v36, %v754_v21  ;;  %v1810_v57 = vrot.slane %v838_v31, %v754_v21  ;;  %v1812_v55 = vrot.slane %v873_v44, %v754_v21  ;;  %v951_v11 = vadd.s32 18, %v1434_v20 }
  0x6c   : > { %1268 = vmatmul.mubr.msk.f32.vlgmr.msra.gmra.mrb[0].mxu0 %vm643_vm9, %v639_v16  ;;  %v783_v58 = vrot.slane %v1413_v9, %v758_v43  ;;  %vm768_vm10 = vcmp.eq.s32.totalorder %v1408_v5, %v1803_v45  ;;  %v914_v62 = vrot.slane %v910_v23, %v754_v21  ;;  %v842_v63 = vrot.slane %v1410_v6, %v758_v43 }
  0x6d   : > { %733 = vmatprep.mubr.f32.mxu0 %v1362_v0  ;;  %vm827_vm11 = vcmp.eq.s32.totalorder %v1408_v5, %v1805_v46  ;;  %v1821_v1 = vrot.slane %v759_v27, %v754_v21  ;;  %v1823_v3 = vrot.slane %v818_v47, %v754_v21  ;;  %v877_v4 = vrot.slane %v869_v34, %v758_v43 }
  0x6e   : > { %v794_v7 = vsel %vm768_vm10, %v1808_v54, 0.0  ;;  %v853_v20 = vsel %vm827_vm11, %v1810_v57, 0.0  ;;  %vm886_vm12 = vcmp.eq.s32.totalorder %v1408_v5, %v1812_v55  ;;  %v992_v9 = vadd.s32 1, %v951_v11 }
  0x6f   : > { %v1829_v8 = vrot.slane %v914_v62, %v754_v21  ;;  %v955_v10 = vrot.slane %v951_v11, %v754_v21  ;;  %v1831_v12 = vrot.slane %v783_v58, %v754_v21  ;;  %v1833_v14 = vrot.slane %v842_v63, %v754_v21 }
  0x70   : > { %1269 = vmatmul.mubr.msk.f32.gmra.mrb[2].mxu0 %vm643_vm9, %v640_v59  ;;  %vm769_vm13 = vcmp.eq.s32.totalorder %v1408_v5, %v1821_v1  ;;  %vm828_vm14 = vcmp.eq.s32.totalorder %v1408_v5, %v1823_v3  ;;  %v1839_v6 = vrot.slane %v877_v4, %v754_v21  ;;  %v918_v15 = vrot.slane %v910_v23, %v758_v43 }
  0x71   : > { %739 = vmatprep.mubr.f32.mxu0 %v1362_v0  ;;  %v861_v22 = vadd.f32 %v853_v20, %v794_v7  ;;  %v894_v24 = vsel %vm886_vm12, %v1808_v54, 0.0  ;;  %v996_v25 = vrot.slane %v992_v9, %v754_v21  ;;  %vm927_vm15 = vcmp.eq.s32.totalorder %v1408_v5, %v1829_v8 }
  0x72   : > { %v1844_v26 = vrot.slane %v955_v10, %v754_v21  ;;  %v795_v28 = vsel %vm769_vm13, %v1831_v12, 0.0  ;;  %v854_v37 = vsel %vm828_vm14, %v1833_v14, 0.0  ;;  %vm887_vm0 = vcmp.eq.s32.totalorder %v1408_v5, %v1839_v6 }
  0x73   : > { %v1850_v38 = vrot.slane %v918_v15, %v754_v21  ;;  %v959_v52 = vrot.slane %v951_v11, %v758_v43  ;;  %v902_v29 = vadd.f32 %v894_v24, %v861_v22  ;;  %v935_v32 = vsel %vm927_vm15, %v1810_v57, 0.0 }
  0x74   : > { %1270 = vmatmul.mubr.msk.f32.gmra.mrb[4].mxu0 %vm643_vm9, %v641_v39  ;;  %v1853_v33 = vrot.slane %v996_v25, %v754_v21  ;;  %v862_v48 = vadd.f32 %v854_v37, %v795_v28  ;;  %vm968_vm1 = vcmp.eq.s32.totalorder %v1408_v5, %v1844_v26  ;;  %v895_v60 = vsel %vm887_vm0, %v1831_v12, 0.0 }
  0x75   : > { %745 = vmatprep.mubr.f32.mxu0 %v1362_v0  ;;  %v1000_v61 = vrot.slane %v992_v9, %v758_v43  ;;  %vm928_vm2 = vcmp.eq.s32.totalorder %v1408_v5, %v1850_v38  ;;  %v1860_v40 = vrot.slane %v959_v52, %v754_v21  ;;  %v943_v49 = vadd.f32 %v935_v32, %v902_v29 }
  0x76   : > { %v976_v13 = vsel %vm968_vm1, %v1808_v54, 0.0  ;;  %vm1009_vm3 = vcmp.eq.s32.totalorder %v1408_v5, %v1853_v33  ;;  %v903_v41 = vadd.f32 %v895_v60, %v862_v48  ;;  %v936_v50 = vsel %vm928_vm2, %v1833_v14, 0.0 }
  0x77   : > { %v1866_v42 = vrot.slane %v1000_v61, %v754_v21  ;;  %vm770_vm4 = vcmp.eq.s32.totalorder %v1426_v17, %v1803_v45  ;;  %vm829_vm5 = vcmp.eq.s32.totalorder %v1426_v17, %v1805_v46  ;;  %vm969_vm6 = vcmp.eq.s32.totalorder %v1408_v5, %v1860_v40 }
  0x78   : > { %1271 = vmatmul.mubr.msk.f32.gmra.mrb[6].mxu0 %vm643_vm9, %v642_v51  ;;  %v984_v56 = vadd.f32 %v976_v13, %v943_v49  ;;  %vm771_vm7 = vcmp.eq.s32.totalorder %v1426_v17, %v1821_v1  ;;  %vm830_vm8 = vcmp.eq.s32.totalorder %v1426_v17, %v1823_v3  ;;  %v1017_v16 = vsel %vm1009_vm3, %v1810_v57, 0.0 }
  0x79   : > { %v944_v59 = vadd.f32 %v936_v50, %v903_v41  ;;  %v796_v39 = vsel %vm770_vm4, %v1808_v54, 0.0  ;;  %v855_v51 = vsel %vm829_vm5, %v1810_v57, 0.0  ;;  %v977_v21 = vsel %vm969_vm6, %v1831_v12, 0.0 }
  0x7a   : > { %vm1010_vm9 = vcmp.eq.s32.totalorder %v1408_v5, %v1866_v42  ;;  %vm888_vm10 = vcmp.eq.s32.totalorder %v1426_v17, %v1812_v55  ;;  %vm929_vm11 = vcmp.eq.s32.totalorder %v1426_v17, %v1829_v8  ;;  %vm970_vm12 = vcmp.eq.s32.totalorder %v1426_v17, %v1844_v26 }
  0x7b   : > { %vm1011_vm13 = vcmp.eq.s32.totalorder %v1426_v17, %v1853_v33  ;;  %v797_v53 = vsel %vm771_vm7, %v1831_v12, 0.0  ;;  %v856_v34 = vsel %vm830_vm8, %v1833_v14, 0.0  ;;  %v863_v35 = vadd.f32 %v855_v51, %v796_v39 }
  0x7c   : > { %vm889_vm14 = vcmp.eq.s32.totalorder %v1426_v17, %v1839_v6  ;;  %v1896_v36 = vadd.f32 %v1017_v16, %v984_v56  ;;  %v985_v43 = vadd.f32 %v977_v21, %v944_v59  ;;  %v1018_v30 = vsel %vm1010_vm9, %v1833_v14, 0.0 }
  0x7d   : > { %v896_v31 = vsel %vm888_vm10, %v1808_v54, 0.0  ;;  %v937_v44 = vsel %vm929_vm11, %v1810_v57, 0.0  ;;  %v978_v23 = vsel %vm970_vm12, %v1808_v54, 0.0  ;;  %v1903_v27 = vsel %vm1011_vm13, %v1810_v57, 0.0 }
  0x7e   : > { %v864_v47 = vadd.f32 %v856_v34, %v797_v53  ;;  %v897_v11 = vsel %vm889_vm14, %v1831_v12, 0.0  ;;  %vm930_vm15 = vcmp.eq.s32.totalorder %v1426_v17, %v1850_v38  ;;  %vm772_vm0 = vcmp.eq.s32.totalorder %v1429_v18, %v1803_v45 }
  0x7f   : > { %vm831_vm1 = vcmp.eq.s32.totalorder %v1429_v18, %v1805_v46  ;;  %v904_v58 = vadd.f32 %v896_v31, %v863_v35  ;;  %vm773_vm2 = vcmp.eq.s32.totalorder %v1429_v18, %v1821_v1  ;;  %vm774_vm3 = vcmp.eq.s32.totalorder %v1432_v19, %v1803_v45 }
  0x80   : > { %vm833_vm4 = vcmp.eq.s32.totalorder %v1432_v19, %v1805_v46  ;;  %v1918_v62 = vadd.f32 %v1018_v30, %v985_v43  ;;  %vm832_vm5 = vcmp.eq.s32.totalorder %v1429_v18, %v1823_v3  ;;  %vm775_vm6 = vcmp.eq.s32.totalorder %v1432_v19, %v1821_v1 }
  0x81   : > { %vm834_vm7 = vcmp.eq.s32.totalorder %v1432_v19, %v1823_v3  ;;  %v905_v63 = vadd.f32 %v897_v11, %v864_v47  ;;  %v938_v4 = vsel %vm930_vm15, %v1833_v14, 0.0  ;;  %v798_v7 = vsel %vm772_vm0, %v1808_v54, 0.0 }
  0x82   : > { %v857_v45 = vsel %vm831_vm1, %v1810_v57, 0.0  ;;  %vm890_vm8 = vcmp.eq.s32.totalorder %v1429_v18, %v1812_v55  ;;  %v799_v46 = vsel %vm773_vm2, %v1831_v12, 0.0  ;;  %v800_v20 = vsel %vm774_vm3, %v1808_v54, 0.0 }
  0x83   : > { %v859_v9 = vsel %vm833_vm4, %v1810_v57, 0.0  ;;  %v858_v1 = vsel %vm832_vm5, %v1833_v14, 0.0  ;;  %vm892_vm9 = vcmp.eq.s32.totalorder %v1432_v19, %v1812_v55  ;;  %v801_v3 = vsel %vm775_vm6, %v1831_v12, 0.0 }
  0x84   : > { %v860_v10 = vsel %vm834_vm7, %v1833_v14, 0.0  ;;  %vm971_vm10 = vcmp.eq.s32.totalorder %v1426_v17, %v1860_v40  ;;  %v865_v15 = vadd.f32 %v857_v45, %v798_v7  ;;  %vm891_vm11 = vcmp.eq.s32.totalorder %v1429_v18, %v1839_v6 }
  0x85   : > { %vm893_vm12 = vcmp.eq.s32.totalorder %v1432_v19, %v1839_v6  ;;  %v945_v22 = vadd.f32 %v937_v44, %v904_v58  ;;  %v898_v24 = vsel %vm890_vm8, %v1808_v54, 0.0  ;;  %vm931_vm13 = vcmp.eq.s32.totalorder %v1429_v18, %v1829_v8 }
  0x86   : > { %v867_v55 = vadd.f32 %v859_v9, %v800_v20  ;;  %v946_v25 = vadd.f32 %v938_v4, %v905_v63  ;;  %v866_v28 = vadd.f32 %v858_v1, %v799_v46  ;;  %v900_v37 = vsel %vm892_vm9, %v1808_v54, 0.0 }
  0x87   : > { %v868_v52 = vadd.f32 %v860_v10, %v801_v3  ;;  %v979_v29 = vsel %vm971_vm10, %v1831_v12, 0.0  ;;  %v899_v32 = vsel %vm891_vm11, %v1831_v12, 0.0  ;;  %vm933_vm14 = vcmp.eq.s32.totalorder %v1432_v19, %v1829_v8 }
  0x88   : > { %v901_v6 = vsel %vm893_vm12, %v1831_v12, 0.0  ;;  %vm1012_vm15 = vcmp.eq.s32.totalorder %v1426_v17, %v1866_v42  ;;  %v906_v48 = vadd.f32 %v898_v24, %v865_v15  ;;  %vm932_vm0 = vcmp.eq.s32.totalorder %v1429_v18, %v1850_v38 }
  0x89   : > { %vm934_vm1 = vcmp.eq.s32.totalorder %v1432_v19, %v1850_v38  ;;  %v986_v60 = vadd.f32 %v978_v23, %v945_v22  ;;  %v939_v61 = vsel %vm931_vm13, %v1810_v57, 0.0  ;;  %vm972_vm2 = vcmp.eq.s32.totalorder %v1429_v18, %v1844_v26 }
  0x8a   : > { %v908_v49 = vadd.f32 %v900_v37, %v867_v55  ;;  %v987_v8 = vadd.f32 %v979_v29, %v946_v25  ;;  %v907_v13 = vadd.f32 %v899_v32, %v866_v28  ;;  %v941_v41 = vsel %vm933_vm14, %v1810_v57, 0.0 }
  0x8b   : > { %v909_v50 = vadd.f32 %v901_v6, %v868_v52  ;;  %v1020_v17 = vsel %vm1012_vm15, %v1833_v14, 0.0  ;;  %v940_v56 = vsel %vm932_vm0, %v1833_v14, 0.0  ;;  %vm974_vm3 = vcmp.eq.s32.totalorder %v1432_v19, %v1844_v26 }
  0x8c   : > { %v942_v38 = vsel %vm934_vm1, %v1833_v14, 0.0  ;;  %v947_v59 = vadd.f32 %v939_v61, %v906_v48  ;;  %vm1013_vm4 = vcmp.eq.s32.totalorder %v1429_v18, %v1853_v33  ;;  %vm973_vm5 = vcmp.eq.s32.totalorder %v1429_v18, %v1860_v40 }
  0x8d   : > { %vm975_vm6 = vcmp.eq.s32.totalorder %v1432_v19, %v1860_v40  ;;  %v1027_v51 = vadd.f32 %v1903_v27, %v986_v60  ;;  %v980_v21 = vsel %vm972_vm2, %v1808_v54, 0.0  ;;  %v949_v53 = vadd.f32 %v941_v41, %v908_v49 }
  0x8e   : > { %vm1015_vm7 = vcmp.eq.s32.totalorder %v1432_v19, %v1853_v33  ;;  %v1028_v34 = vadd.f32 %v1020_v17, %v987_v8  ;;  %v948_v35 = vadd.f32 %v940_v56, %v907_v13  ;;  %v982_v43 = vsel %vm974_vm3, %v1808_v54, 0.0 }
  0x8f   : > { %v950_v30 = vadd.f32 %v942_v38, %v909_v50  ;;  %v1021_v31 = vsel %vm1013_vm4, %v1810_v57, 0.0  ;;  %v981_v40 = vsel %vm973_vm5, %v1831_v12, 0.0  ;;  %v983_v44 = vsel %vm975_vm6, %v1831_v12, 0.0 }
  0x90   : > { %v988_v27 = vadd.f32 %v980_v21, %v947_v59  ;;  %vm1014_vm8 = vcmp.eq.s32.totalorder %v1429_v18, %v1866_v42  ;;  %v1023_v26 = vsel %vm1015_vm7, %v1810_v57, 0.0  ;;  %vm1016_vm9 = vcmp.eq.s32.totalorder %v1432_v19, %v1866_v42 }
  0x91   : > { %v990_v11 = vadd.f32 %v982_v43, %v949_v53  ;;  %v1045_v58 = vadd.s32 1, %v1408_v5  ;;  %v989_v4 = vadd.f32 %v981_v40, %v948_v35  ;;  %v991_v7 = vadd.f32 %v983_v44, %v950_v30 }
  0x92   : > { %v1022_v45 = vsel %vm1014_vm8, %v1833_v14, 0.0  ;;  %v1024_v57 = vsel %vm1016_vm9, %v1833_v14, 0.0  ;;  %v1029_v20 = vadd.f32 %v1021_v31, %v988_v27  ;;  %v1042_v9 = vand.u32 127, %v228_v2 }
  0x93   : > { %v1043_v1 = vmul.u32 9, %v1408_v5  ;;  %v1046_v3 = vmul.u32 9, %v1045_v58  ;;  %v1030_v10 = vadd.f32 %v1022_v45, %v989_v4  ;;  %vm1054_vm10 = vcmask 1042432  }
  0x94   : > { %vm1363_vm13 = vmmov 1   ;;  %vm1050_vm0 = vcmask 220160  }
  0x95   : > { %vm1044_vm11 = vcmp.ge.s32.totalorder %v1042_v9, %v1043_v1  ;;  %vm1047_vm12 = vcmp.lt.s32.totalorder %v1042_v9, %v1046_v3  ;;  %vm1305_vm14 = vmpackc.low %vm1054_vm10, %vm1363_vm13 }
  0x96   : > { %vm1048_vm15 = vmand %vm1044_vm11, %vm1047_vm12 }
  0x97   : > { %v1049_v5 = vsel %vm1048_vm15, 1.0, %v1362_v0 }
 0x13f   : > { %v729_v16 = vpop.f32.mrb[0].mxu0 }
 0x140   : > { %v731_v39 = vpop.f32.mrb[1].mxu0  ;;  %v1033_v33 = vmul.f32 %v1896_v36, %v729_v16  ;;  %v1031_v36 = vadd.f32 %v1023_v26, %v990_v11 }
 0x141   : > { %v1034_v63 = vmul.f32 %v1918_v62, %v731_v39  ;;  %v1032_v62 = vadd.f32 %v1024_v57, %v991_v7 }
 0x143   : > { %v735_v23 = vpop.f32.mrb[2].mxu0 }
 0x144   : > { %v1035_v54 = vmul.f32 %v1027_v51, %v735_v23  ;;  %v737_v47 = vpop.f32.mrb[3].mxu0 }
 0x145   : > { %v1036_v12 = vmul.f32 %v1028_v34, %v737_v47 }
 0x146   : > { %v1302_v18 = vpack.c.bf16 %v1035_v54, %v1033_v33 }
 0x147   : > { %v741_v46 = vpop.f32.mrb[4].mxu0  ;;  %v1300_v19 = vpack.c.bf16 %v1036_v12, %v1034_v63 }
 0x148   : > { %v743_v42 = vpop.f32.mrb[5].mxu0  ;;  %v1037_v22 = vmul.f32 %v1029_v20, %v741_v46 }
 0x149   : > { %1301 = vmatprep.subr.bf16.mxu1 %v1300_v19  ;;  %v1038_v14 = vmul.f32 %v1030_v10, %v743_v42 }
 0x14a   : > { %1303 = vmatpush1.bf16.msra.mxu1 %v1302_v18 }
 0x14b   : > { %v747_v15 = vpop.f32.mrb[6].mxu0 }
 0x14c   : > { %v1039_v24 = vmul.f32 %v1031_v36, %v747_v15  ;;  %v749_v55 = vpop.f32.mrb[7].mxu0 }
 0x14d   : > { %v1040_v25 = vmul.f32 %v1032_v62, %v749_v55 }
 0x14e   : > { %v1307_v28 = vpack.c.bf16 %v1039_v24, %v1037_v22 }
 0x14f   : > { %v1304_v2 = vpack.c.bf16 %v1040_v25, %v1038_v14 }
 0x151   : > { %1306 = vmatprep.subr.msk.bf16.mxu1 %vm1305_vm14, %v1304_v2 }
 0x152   : > { %1309 = vmatpush1.bf16.msk.msra.mxu1 %vm1305_vm14, %v1307_v28 }
 0x155   : > { %1274 = vmatmul.mubr.msk.f32.vlgmr.msra.gmra.mrb[0].mxu1 %vm1050_vm0, %v1049_v5 }
 0x228   : > { %v1127_v37 = vpop.f32.mrb[0].mxu1 }
 0x229   : > { %v1129_v52 = vpop.f32.mrb[1].mxu1 }
 0x22a   : > { %v1134_v29 = vcombine.low %v1127_v37, %v1129_v52 }
 0x22c   : > { %1136 = vst [vmem:[%s218_s23] sm:$0x77] %v1134_v29 }
 0x22d PF: > { %s12_s11 = sadd.s32 1, %s1360_s11   ;;  %s2016_s9 = smov %s1356_s10 }
 0x22e   : > { %p9_p5 = scmp.ge.s32.totalorder %s12_s11, 4   ;;  %s2017_s10 = smov %s2019_s12 }
 0x230   :  { %11 = sbr.rel (!%p9_p5) target bundleno = 2 (0x2), region = 61 }

</bundles_post_ra>
